<compile_context>
chip_gen: v7x
topology: tpu7x:2x2x1
jax: 0.10.0
libtpu: 0.0.40
codegen_flags: <defaults>
</compile_context>

<pallas_src>
import jax
import jax.numpy as jnp
import numpy as np
from jax.experimental import pallas as pl
from jax.experimental.pallas import tpu as pltpu


# ----------------------------------------------------------------------------
# Hardware / tiling helpers
# ----------------------------------------------------------------------------
def _vmem_capacity_bytes() -> int:
    """VMEM capacity of the attached TPU; conservative 64 MiB (v7x) fallback."""
    try:
        cap = int(pltpu.get_tpu_info().vmem_capacity_bytes)
        if cap > 0:
            return cap
    except Exception:
        pass
    return 64 << 20


def _round_up(x: int, m: int) -> int:
    return ((x + m - 1) // m) * m


def _shrink8(x: int) -> int:
    """Next smaller multiple of 8 (roughly halving), min 8."""
    return max(8, (x // 2) // 8 * 8)


def _fused_footprint(tT, tU, H, V, out_bytes):
    """Estimated VMEM bytes for one grid step of the fused joint kernel."""
    m = tT * tU
    buf = 2 * (tT * H + tU * H) * 2          # double-buffered bf16 proj blocks
    buf += (H * V * 2 + V * 4)               # single-buffered w2 (bf16) + b2 (f32)
    buf += 2 * m * V * out_bytes             # double-buffered output block
    tmp = m * H * (4 + 2)                    # f32 hidden + bf16 copy for the MXU
    tmp += 3 * m * V * 4                     # logits / exp / normalized f32 temps
    return buf + tmp


def _vtiled_footprint(tT, tU, tV, H, out_bytes):
    """Estimated VMEM bytes for one grid step of the V-tiled kernels."""
    m = tT * tU
    buf = 2 * (tT * H + tU * H) * 2          # bf16 proj blocks
    buf += 2 * (H * tV * 2 + tV * 4)         # streamed w2/b2 vocab tiles
    buf += 2 * m * tV * out_bytes            # output vocab tile (normalize pass)
    buf += 2 * m * 4                         # stats block
    scratch = m * H * 2 + 2 * m * 4          # cached bf16 hidden + running stats
    tmp = m * H * 4 + 3 * m * tV * 4         # f32 hidden temp + logits temps
    return buf + scratch + tmp


# ----------------------------------------------------------------------------
# fc1 projection kernel:  proj = x @ W + b   (b == 0 for the label branch)
# ----------------------------------------------------------------------------
def _fc1_project_kernel(x_ref, w_ref, b_ref, out_ref):
    # x_ref: (1, N, D) bf16   w_ref: (D, H) bf16   b_ref: (1, H) f32
    proj = jnp.dot(x_ref[0], w_ref[...], preferred_element_type=jnp.float32)
    out_ref[0] = (proj + b_ref[...]).astype(out_ref.dtype)


def _fc1_project(x_bf16, w_bf16, b_f32):
    # fc1 is O((T+U)*D*H) -- negligible vs fc2 -- so a simple per-batch grid
    # with full blocks is plenty.
    B, N, D = x_bf16.shape
    H = w_bf16.shape[1]
    grid_spec = pltpu.PrefetchScalarGridSpec(
        num_scalar_prefetch=0,
        grid=(B,),
        in_specs=[
            pl.BlockSpec((1, N, D), lambda b: (b, 0, 0)),
            pl.BlockSpec((D, H), lambda b: (0, 0)),
            pl.BlockSpec((1, H), lambda b: (0, 0)),
        ],
        out_specs=pl.BlockSpec((1, N, H), lambda b: (b, 0, 0)),
    )
    return pl.pallas_call(
        _fc1_project_kernel,
        out_shape=jax.ShapeDtypeStruct((B, N, H), jnp.bfloat16),
        grid_spec=grid_spec,
        compiler_params=pltpu.CompilerParams(
            dimension_semantics=("parallel",)),
    )(x_bf16, w_bf16, b_f32)


# ----------------------------------------------------------------------------
# Fused joint kernel: tanh(broadcast add) -> fc2 -> log_softmax, whole V tile
# ----------------------------------------------------------------------------
def _joint_fused_kernel(a_ref, l_ref, w2_ref, b2_ref, out_ref):
    # a_ref: (1, tT, H) bf16 (b1 folded in)   l_ref: (1, tU, H) bf16
    # w2_ref: (H, V) bf16   b2_ref: (1, V) f32   out_ref: (1, tT, tU, V)
    a = a_ref[0].astype(jnp.float32)                      # (tT, H)
    l = l_ref[0].astype(jnp.float32)                      # (tU, H)
    tT, H = a.shape
    tU = l.shape[0]
    V = w2_ref.shape[1]

    h = jnp.tanh(a[:, None, :] + l[None, :, :])           # (tT, tU, H) f32
    h2 = h.reshape(tT * tU, H).astype(jnp.bfloat16)       # layout no-op (tU%8==0)

    logits = jnp.dot(h2, w2_ref[...], preferred_element_type=jnp.float32)
    logits = logits + b2_ref[...]

    m = jnp.max(logits, axis=-1, keepdims=True)
    z = logits - m
    lse = jnp.log(jnp.sum(jnp.exp(z), axis=-1, keepdims=True))
    out_ref[0] = (z - lse).reshape(tT, tU, V).astype(out_ref.dtype)


def _joint_fused(a_proj, l_proj, w2, b2, out_dtype, tT, tU, vmem_limit):
    B, Tp, H = a_proj.shape
    _, Up, _ = l_proj.shape
    V = w2.shape[1]
    nT, nU = Tp // tT, Up // tU
    out_bytes = jnp.dtype(out_dtype).itemsize

    cost = pl.CostEstimate(
        flops=2 * B * Tp * Up * H * V,
        transcendentals=B * Tp * Up * (H + V),
        bytes_accessed=(B * Tp * Up * V * out_bytes        # output writeback
                        + nU * B * Tp * H * 2              # a_proj re-read per U tile
                        + nT * B * Up * H * 2              # l_proj re-read per T tile
                        + H * V * 2 + V * 4),
    )

    def _call(single_buffer_weights):
        if single_buffer_weights:
            # Grid-invariant fc2 weights: single-buffer (double-buffering them
            # only burns VMEM since their block index never changes).
            w2_spec = pl.BlockSpec((H, V), lambda it, b, iu: (0, 0),
                                   pipeline_mode=pl.Buffered(1))
            b2_spec = pl.BlockSpec((1, V), lambda it, b, iu: (0, 0),
                                   pipeline_mode=pl.Buffered(1))
        else:
            w2_spec = pl.BlockSpec((H, V), lambda it, b, iu: (0, 0))
            b2_spec = pl.BlockSpec((1, V), lambda it, b, iu: (0, 0))

        grid_spec = pltpu.PrefetchScalarGridSpec(
            num_scalar_prefetch=0,
            grid=(nT, B, nU),          # leading axis nT: good megacore split at B==1
            in_specs=[
                pl.BlockSpec((1, tT, H), lambda it, b, iu: (b, it, 0)),
                pl.BlockSpec((1, tU, H), lambda it, b, iu: (b, iu, 0)),
                w2_spec,
                b2_spec,
            ],
            out_specs=pl.BlockSpec((1, tT, tU, V),
                                   lambda it, b, iu: (b, it, iu, 0)),
        )
        return pl.pallas_call(
            _joint_fused_kernel,
            out_shape=jax.ShapeDtypeStruct((B, Tp, Up, V), out_dtype),
            grid_spec=grid_spec,
            compiler_params=pltpu.CompilerParams(
                dimension_semantics=("parallel", "parallel", "parallel"),
                vmem_limit_bytes=vmem_limit),
            cost_estimate=cost,
        )(a_proj, l_proj, w2, b2)

    try:
        return _call(True)
    except Exception:
        # Fallback if pipeline_mode / pl.Buffered(1) is unavailable.
        return _call(False)


# ----------------------------------------------------------------------------
# V-tiled path: pass 1 = online max / logsumexp, pass 2 = logits - logsumexp.
# The tanh hidden is cached in VMEM scratch and computed once per (T,U) tile.
# ----------------------------------------------------------------------------
def _compute_hidden_into(a_ref, l_ref, h_sc):
    a = a_ref[0].astype(jnp.float32)                       # (tT, H)
    l = l_ref[0].astype(jnp.float32)                       # (tU, H)
    h = jnp.tanh(a[:, None, :] + l[None, :, :])            # (tT, tU, H)
    h_sc[...] = h.reshape(h_sc.shape).astype(h_sc.dtype)   # (tT*tU, H) bf16


def _joint_stats_kernel(a_ref, l_ref, w2_ref, b2_ref, stats_ref,
                        h_sc, m_sc, s_sc):
    iv = pl.program_id(3)

    @pl.when(iv == 0)
    def _():
        _compute_hidden_into(a_ref, l_ref, h_sc)
        m_sc[...] = jnp.full(m_sc.shape, -jnp.inf, m_sc.dtype)
        s_sc[...] = jnp.zeros(s_sc.shape, s_sc.dtype)

    logits = jnp.dot(h_sc[...], w2_ref[...], preferred_element_type=jnp.float32)
    logits = logits + b2_ref[...]
    m_new = jnp.maximum(m_sc[...], jnp.max(logits, axis=-1, keepdims=True))
    s_sc[...] = (s_sc[...] * jnp.exp(m_sc[...] - m_new)
                 + jnp.sum(jnp.exp(logits - m_new), axis=-1, keepdims=True))
    m_sc[...] = m_new

    @pl.when(iv == pl.num_programs(3) - 1)
    def _():
        tT = a_ref.shape[1]
        tU = l_ref.shape[1]
        stats_ref[0] = (m_sc[...] + jnp.log(s_sc[...])).reshape(tT, tU, 1)


def _joint_norm_kernel(a_ref, l_ref, w2_ref, b2_ref, stats_ref, out_ref, h_sc):
    iv = pl.program_id(3)

    @pl.when(iv == 0)
    def _():
        _compute_hidden_into(a_ref, l_ref, h_sc)

    logits = jnp.dot(h_sc[...], w2_ref[...], preferred_element_type=jnp.float32)
    logits = logits + b2_ref[...]
    tT = a_ref.shape[1]
    tU = l_ref.shape[1]
    tV = w2_ref.shape[1]
    out_ref[0] = (logits.reshape(tT, tU, tV) - stats_ref[0]).astype(out_ref.dtype)


def _joint_vtiled(a_proj, l_proj, w2, b2, out_dtype, tT, tU, tV, vmem_limit):
    B, Tp, H = a_proj.shape
    _, Up, _ = l_proj.shape
    V = w2.shape[1]
    nT, nU, nV = Tp // tT, Up // tU, V // tV
    M = tT * tU
    out_bytes = jnp.dtype(out_dtype).itemsize

    in_specs = [
        pl.BlockSpec((1, tT, H), lambda it, b, iu, iv: (b, it, 0)),
        pl.BlockSpec((1, tU, H), lambda it, b, iu, iv: (b, iu, 0)),
        pl.BlockSpec((H, tV), lambda it, b, iu, iv: (0, iv)),
        pl.BlockSpec((1, tV), lambda it, b, iu, iv: (0, iv)),
    ]
    sem = ("parallel", "parallel", "parallel", "arbitrary")
    w2_stream_bytes = B * nT * nU * H * V * 2
    proj_bytes = nU * B * Tp * H * 2 + nT * B * Up * H * 2

    # Pass 1: running max / sum-exp over vocab tiles -> logsumexp stats.
    stats = pl.pallas_call(
        _joint_stats_kernel,
        out_shape=jax.ShapeDtypeStruct((B, Tp, Up, 1), jnp.float32),
        grid_spec=pltpu.PrefetchScalarGridSpec(
            num_scalar_prefetch=0,
            grid=(nT, B, nU, nV),
            in_specs=in_specs,
            out_specs=pl.BlockSpec((1, tT, tU, 1),
                                   lambda it, b, iu, iv: (b, it, iu, 0)),
            scratch_shapes=[pltpu.VMEM((M, H), jnp.bfloat16),
                            pltpu.VMEM((M, 1), jnp.float32),
                            pltpu.VMEM((M, 1), jnp.float32)]),
        compiler_params=pltpu.CompilerParams(dimension_semantics=sem,
                                             vmem_limit_bytes=vmem_limit),
        cost_estimate=pl.CostEstimate(
            flops=2 * B * Tp * Up * H * V,
            transcendentals=B * Tp * Up * (H + V),
            bytes_accessed=w2_stream_bytes + proj_bytes + B * Tp * Up * 4),
    )(a_proj, l_proj, w2, b2)

    # Pass 2: recompute logits per vocab tile and subtract the logsumexp.
    out = pl.pallas_call(
        _joint_norm_kernel,
        out_shape=jax.ShapeDtypeStruct((B, Tp, Up, V), out_dtype),
        grid_spec=pltpu.PrefetchScalarGridSpec(
            num_scalar_prefetch=0,
            grid=(nT, B, nU, nV),
            in_specs=in_specs + [
                pl.BlockSpec((1, tT, tU, 1), lambda it, b, iu, iv: (b, it, iu, 0)),
            ],
            out_specs=pl.BlockSpec((1, tT, tU, tV),
                                   lambda it, b, iu, iv: (b, it, iu, iv)),
            scratch_shapes=[pltpu.VMEM((M, H), jnp.bfloat16)]),
        compiler_params=pltpu.CompilerParams(dimension_semantics=sem,
                                             vmem_limit_bytes=vmem_limit),
        cost_estimate=pl.CostEstimate(
            flops=2 * B * Tp * Up * H * V,
            transcendentals=B * Tp * Up * H,
            bytes_accessed=(B * Tp * Up * V * out_bytes + w2_stream_bytes
                            + proj_bytes + B * Tp * Up * 4)),
    )(a_proj, l_proj, w2, b2, stats)
    return out


# ----------------------------------------------------------------------------
# Public wrapper
# ----------------------------------------------------------------------------
def joint_net(audio_encoder, label_encoder, params, *,
              out_dtype=jnp.float32,      # bf16 recommended for decoding paths
              t_tile_target=None, u_tile_target=None, v_tile=None):
    """audio_encoder: (B, T, Da), label_encoder: (B, U, Dl) -> (B, T, U, V)."""
    w1a = params["w1a"].astype(jnp.bfloat16)
    w1l = params["w1l"].astype(jnp.bfloat16)
    b1 = params["b1"].astype(jnp.float32)
    w2 = params["w2"].astype(jnp.bfloat16)
    b2 = params["b2"].astype(jnp.float32)

    B, T, Da = audio_encoder.shape
    _, U, Dl = label_encoder.shape
    H = w1a.shape[1]
    V = w2.shape[1]
    out_bytes = jnp.dtype(out_dtype).itemsize

    # Generation-aware budgets (v5e/v6e: 128 MiB VMEM, v7x: 64 MiB).
    cap = _vmem_capacity_bytes()
    budget = int(cap * 0.55)
    if t_tile_target is None:
        t_tile_target = 64 if cap >= (96 << 20) else 32
    if u_tile_target is None:
        u_tile_target = 16

    # 8-aligned tiles (T/U are padded to multiples of the tile, never the
    # whole-dimension fallback, so the in-kernel reshape stays a layout no-op).
    tT = min(_round_up(T, 8), _round_up(t_tile_target, 8))
    tU = min(_round_up(U, 8), _round_up(u_tile_target, 8))

    use_v_axis = v_tile is not None
    tV = V
    if use_v_axis:
        if V % v_tile != 0 or v_tile % 128 != 0:
            raise ValueError("v_tile must be a multiple of 128 dividing num_vocabs")
        tV = v_tile
    elif _fused_footprint(tT, tU, H, V, out_bytes) > budget:
        if V % 128 == 0:
            # Large vocab: keep M = tT*tU big for the MXU and stream V instead.
            use_v_axis = True
            tV = 128
            for cand in range(V, 127, -128):
                if V % cand == 0 and _vtiled_footprint(tT, tU, cand, H,
                                                       out_bytes) <= budget:
                    tV = cand
                    break
            while (_vtiled_footprint(tT, tU, tV, H, out_bytes) > budget
                   and tT * tU > 256 and (tT > 8 or tU > 8)):
                if tT >= tU and tT > 8:
                    tT = _shrink8(tT)
                else:
                    tU = _shrink8(tU)
        else:
            while (_fused_footprint(tT, tU, H, V, out_bytes) > budget
                   and (tT > 8 or tU > 8)):
                if tT >= tU and tT > 8:
                    tT = _shrink8(tT)
                else:
                    tU = _shrink8(tU)

    footprint = (_vtiled_footprint(tT, tU, tV, H, out_bytes) if use_v_axis
                 else _fused_footprint(tT, tU, H, V, out_bytes))
    vmem_limit = int(min(int(cap * 0.9),
                         max(footprint + footprint // 4 + (4 << 20), 32 << 20)))

    # Pad T/U to tile multiples (zeros), cast encoders to bf16 in the wrapper.
    Tp, Up = _round_up(T, tT), _round_up(U, tU)
    audio_p = audio_encoder.astype(jnp.bfloat16)
    label_p = label_encoder.astype(jnp.bfloat16)
    if Tp != T:
        audio_p = jnp.pad(audio_p, ((0, 0), (0, Tp - T), (0, 0)))
    if Up != U:
        label_p = jnp.pad(label_p, ((0, 0), (0, Up - U), (0, 0)))

    # fc1 hoisted out of the (T,U) product; b1 folded into the audio branch.
    a_proj = _fc1_project(audio_p, w1a, b1)                          # (B,Tp,H) bf16
    l_proj = _fc1_project(label_p, w1l, jnp.zeros((1, H), jnp.float32))

    if use_v_axis:
        out = _joint_vtiled(a_proj, l_proj, w2, b2, out_dtype, tT, tU, tV,
                            vmem_limit)
    else:
        out = _joint_fused(a_proj, l_proj, w2, b2, out_dtype, tT, tU,
                           vmem_limit)

    if Tp != T or Up != U:
        out = out[:, :T, :U, :]
    return out


# ----------------------------------------------------------------------------
# Pure-JAX reference (mirrors the PyTorch forward, f32 throughout)
# ----------------------------------------------------------------------------
def joint_net_reference(audio_encoder, label_encoder, params):
    B, T, Da = audio_encoder.shape
    _, U, Dl = label_encoder.shape
    a = jnp.broadcast_to(audio_encoder[:, :, None, :], (B, T, U, Da))
    l = jnp.broadcast_to(label_encoder[:, None, :, :], (B, T, U, Dl))
    x = jnp.concatenate([a, l], axis=-1)
    w1 = jnp.concatenate([params["w1a"], params["w1l"]], axis=0)
    h = jnp.tanh(x @ w1 + params["b1"][0])
    logits = h @ params["w2"] + params["b2"][0]
    return jax.nn.log_softmax(logits, axis=-1)


def init_params(key, output_size, inner_size, num_vocabs):
    da = output_size // 2
    k1, k2, k3, k4 = jax.random.split(key, 4)
    s1 = 1.0 / np.sqrt(output_size)
    s2 = 1.0 / np.sqrt(inner_size)
    w1 = jax.random.uniform(k1, (output_size, inner_size), jnp.float32, -s1, s1)
    return {
        "w1a": w1[:da],                                                        # (Da,H)
        "w1l": w1[da:],                                                        # (Dl,H)
        "b1": jax.random.uniform(k2, (1, inner_size), jnp.float32, -s1, s1),   # (1,H)
        "w2": jax.random.uniform(k3, (inner_size, num_vocabs), jnp.float32, -s2, s2),
        "b2": jax.random.uniform(k4, (1, num_vocabs), jnp.float32, -s2, s2),   # (1,V)
    }


if __name__ == "__main__":
    # Small shapes consistent with the module: output_size (fc1 in) = Da + Dl.
    # T/U deliberately not tile-multiples to exercise the padding path.
    B, T, U = 2, 24, 12
    output_size = 128          # Da = Dl = 64
    inner_size = 128
    num_vocabs = 256

    key = jax.random.PRNGKey(0)
    ka, kl, kp = jax.random.split(key, 3)
    da = output_size // 2
    dl = output_size - da
    audio = jax.random.normal(ka, (B, T, da), jnp.float32)
    label = jax.random.normal(kl, (B, U, dl), jnp.float32)
    params = init_params(kp, output_size, inner_size, num_vocabs)

    ref = np.asarray(joint_net_reference(audio, label, params))

    # 1) Fused path, f32 output (training / loss path).
    out = joint_net(audio, label, params, out_dtype=jnp.float32,
                    t_tile_target=16, u_tile_target=8)
    out = jax.block_until_ready(out)
    np.testing.assert_allclose(np.asarray(out, np.float32), ref,
                               atol=5e-2, rtol=2e-2)

    # 2) V-tiled two-pass (online logsumexp) path, forced with a small vocab tile.
    out_v = joint_net(audio, label, params, out_dtype=jnp.float32,
                      t_tile_target=16, u_tile_target=8, v_tile=128)
    out_v = jax.block_until_ready(out_v)
    np.testing.assert_allclose(np.asarray(out_v, np.float32), ref,
                               atol=5e-2, rtol=2e-2)

    # 3) bf16 writeback (decoding path: halves the dominant HBM writeback).
    out_bf = joint_net(audio, label, params, out_dtype=jnp.bfloat16,
                       t_tile_target=16, u_tile_target=8)
    out_bf = jax.block_until_ready(out_bf)
    np.testing.assert_allclose(np.asarray(out_bf, np.float32), ref,
                               atol=1e-1, rtol=5e-2)

    print("KERNEL_OK")
</pallas_src>

<mosaic_0001>
module attributes {stable_mosaic.version = 11 : i64} {
  func.func @_fc1_project_kernel(%arg0: i32, %arg1: memref<1x32x64xbf16, #tpu.memory_space<vmem>>, %arg2: memref<64x128xbf16, #tpu.memory_space<vmem>>, %arg3: memref<1x128xf32, #tpu.memory_space<vmem>>, %arg4: memref<1x32x128xbf16, #tpu.memory_space<vmem>>) attributes {dimension_semantics = [#tpu.dimension_semantics<parallel>], iteration_bounds = array<i64: 2>, scalar_prefetch = 0 : i64, scratch_operands = 0 : i64, tpu.core_type = #tpu.core_type<tc>, window_params = [{transform_indices = @transform_0, window_bounds = array<i64: 1, 32, 64>}, {pipeline_mode = #tpu.pipeline_mode<synchronous>, transform_indices = @transform_1, window_bounds = array<i64: 64, 128>}, {pipeline_mode = #tpu.pipeline_mode<synchronous>, transform_indices = @transform_2, window_bounds = array<i64: 1, 128>}, {transform_indices = @transform_3, window_bounds = array<i64: 1, 32, 128>}]} {
    %c0 = arith.constant 0 : index
    %c0_0 = arith.constant 0 : index
    %c0_1 = arith.constant 0 : index
    %0 = vector.load %arg1[%c0, %c0_0, %c0_1] : memref<1x32x64xbf16, #tpu.memory_space<vmem>>, vector<1x32x64xbf16>
    %1 = vector.shape_cast %0 : vector<1x32x64xbf16> to vector<32x64xbf16>
    %c0_2 = arith.constant 0 : index
    %c0_3 = arith.constant 0 : index
    %2 = vector.load %arg2[%c0_2, %c0_3] : memref<64x128xbf16, #tpu.memory_space<vmem>>, vector<64x128xbf16>
    %cst = arith.constant dense<0.000000e+00> : vector<32x128xf32>
    %3 = tpu.matmul %1, %2, %cst {dimension_numbers = #tpu.dot_dimension_numbers<[1], [0], [0], [1], [0, 0, 1, 1], [], []>} : vector<32x64xbf16>, vector<64x128xbf16>, vector<32x128xf32> -> vector<32x128xf32>
    %c0_4 = arith.constant 0 : index
    %c0_5 = arith.constant 0 : index
    %4 = vector.load %arg3[%c0_4, %c0_5] : memref<1x128xf32, #tpu.memory_space<vmem>>, vector<1x128xf32>
    %5 = vector.broadcast %4 : vector<1x128xf32> to vector<32x128xf32>
    %6 = arith.addf %3, %5 : vector<32x128xf32>
    %7 = arith.truncf %6 : vector<32x128xf32> to vector<32x128xbf16>
    %c0_6 = arith.constant 0 : index
    %c0_7 = arith.constant 0 : index
    %c0_8 = arith.constant 0 : index
    %8 = vector.load %arg4[%c0_6, %c0_7, %c0_8] : memref<1x32x128xbf16, #tpu.memory_space<vmem>>, vector<1x32x128xbf16>
    %9 = vector.shape_cast %8 : vector<1x32x128xbf16> to vector<32x128xbf16>
    %10 = vector.shape_cast %7 : vector<32x128xbf16> to vector<1x32x128xbf16>
    tpu.vector_store %arg4[%c0_6, %c0_7, %c0_8], %10 {strides = array<i32>} : memref<1x32x128xbf16, #tpu.memory_space<vmem>>, vector<1x32x128xbf16>,
    return
  }
  func.func @transform_0(%arg0: i32) -> (i32, i32, i32) {
    %c0_i32 = arith.constant 0 : i32
    %c0_i32_0 = arith.constant 0 : i32
    %c0_i32_1 = arith.constant 0 : i32
    return %arg0, %c0_i32, %c0_i32_0 : i32, i32, i32
  }
  func.func @transform_1(%arg0: i32) -> (i32, i32) {
    %c0_i32 = arith.constant 0 : i32
    %c0_i32_0 = arith.constant 0 : i32
    %c0_i32_1 = arith.constant 0 : i32
    return %c0_i32, %c0_i32_0 : i32, i32
  }
  func.func @transform_2(%arg0: i32) -> (i32, i32) {
    %c0_i32 = arith.constant 0 : i32
    %c0_i32_0 = arith.constant 0 : i32
    %c0_i32_1 = arith.constant 0 : i32
    return %c0_i32, %c0_i32_0 : i32, i32
  }
  func.func @transform_3(%arg0: i32) -> (i32, i32, i32) {
    %c0_i32 = arith.constant 0 : i32
    %c0_i32_0 = arith.constant 0 : i32
    %c0_i32_1 = arith.constant 0 : i32
    return %arg0, %c0_i32, %c0_i32_0 : i32, i32, i32
  }
}

</mosaic_0001>

<bundles_post_ra>
// kernel: tpu_custom_call.1
= control target key start
LH: loop header
LB: loop body
LE: loop exit
PB: predicated region body
PF: predicated region fallthrough
CT: control target
= control target key end

     0   :  { %8 = vsyncpa [#allocation3], 0  ;;  %s929_s0 = inlined_call_operand.hbm [shape: bf16[2,32,64], index: 0, kind: input, shape index: {}]   ;;  %s930_s1 = inlined_call_operand.hbm [shape: bf16[64,128], index: 1, kind: input, shape index: {}]   ;;  %s931_s2 = inlined_call_operand.vmem [shape: f32[1,128], index: 2, kind: input, shape index: {}]   ;;  %s932_s3 = inlined_call_operand.hbm [shape: bf16[2,32,128], index: 3, kind: output, shape index: {}]  }
   0x1   :  { %10 = vsyncpa [#allocation3 + $0x1], 0 }
   0x2   :  { %11 = vsyncpa [#allocation6], 0 }
   0x3   :  { %12 = vsyncpa [#allocation4], 0 }
   0x4   :  { %14 = vsyncpa [#allocation4 + $0x1], 0  ;;  %s719_s12 = smov 0   ;;  %s721_s13 = smov 0  }
   0x5   :  { %s723_s14 = smov 0   ;;  %s725_s15 = smov 0  }
   0x6 LB: > { %s740_s16 = sadd.s32 4294967295, %s690_s15   ;;  %s431_s17 = sadd.s32 4294967294, %s690_s15   ;;  %s690_s15 = sphi %s725_s15, %s952_s15   ;;  %s686_s14 = sphi %s723_s14, %s951_s14   ;;  %s682_s13 = sphi %s721_s13, %s950_s13   ;;  %s678_s12 = sphi %s719_s12, %s949_s12  }
   0x7   : > { %p40_p0 = scmp.ne.s32.totalorder %s682_s13, %s678_s12  ;;  %p933_p1 = scmp.eq.s32.totalorder %s740_s16, 0 }
   0x8   : > { %p112_p3 = scmp.eq.s32.totalorder %s431_s17, 1  ;;  %p432_p5 = scmp.ge.s32.totalorder %s690_s15, 1 }
   0x9   : > { %p749_p4 = por %p933_p1, %p40_p0  ;;  %p119_p7 = scmp.lt.s32.totalorder %s690_s15, 3 }
   0xa   : > { %p754_p6 = por %p112_p3, %p40_p0  ;;  %s692_s21 = smov [#allocation5]  }
   0xb   : > { %s936_s18 = scalar_select %p749_p4, 1, 0 }
   0xc   : > { %s937_s19 = scalar_select %p754_p6, 1, 0 }
   0xd   : > { %p759_p8 = pnand %p432_p5, %p119_p7  ;;  %s131_s22 = sshll.u32 %s692_s21, 4  ;;  %s763_s22 = int_to_ptr.vmem [resolvable:$true] %s131_s22 }
   0xe   : > { %s775_s24 = sadd.s32 1, %s690_s15   ;;  %s27_s25 = sadd.s32 1, %s686_s14 }
   0xf   : > { %s938_s20 = scalar_select %p759_p8, 1, 0 }
  0x10   : > { %p503_p9 = pneg %p759_p8  ;;  %s24_s26 = ssub.s32 %s690_s15, %s775_s24 }
  0x11   : > { %s562_s29 = scalar_lea.hbm %s930_s1, 512 }
  0x12   : > { %p770_p11 = pnand %p503_p9, %p933_p1  ;;  %p563_p12 = scmp.ne.s32.totalorder %s930_s1, %s562_s29 }
  0x13   : > { %p569_p5 = scmp.lt.u32.totalorder %s562_s29, %s930_s1 }
  0x14   : > { %p564_p13 = pneg %p770_p11 }
  0x16   : > { %p565_p0 = pnand %p564_p13, %p563_p12 }
  0x18   : > { %p566_p3 = pneg %p565_p0 }
  0x1a   : > { %p571_p7 = pnand %p569_p5, %p566_p3 }
  0x1c   : > { %574 = shalt.err (!%p571_p7)
}
  0x1d   : > { %s575_s7 = scalar_lea.vmem %s763_s22, 512  ;;  %p583_p2 = scmp.lt.s32.totalorder %s763_s22, %s763_s22 }
  0x1e   : > { %p576_p9 = scmp.ne.s32.totalorder %s763_s22, %s575_s7  ;;  %p584_p6 = scmp.lt.s32.totalorder %s575_s7, %s575_s7 }
  0x20   : > { %p578_p10 = pnand %p576_p9, %p564_p13  ;;  %p585_p4 = por %p584_p6, %p583_p2 }
  0x22   : > { %p579_p1 = pneg %p578_p10 }
  0x24   : > { %p586_p8 = pnand %p585_p4, %p579_p1 }
  0x26   : > { %589 = shalt.err (!%p586_p8)
}
  0x27   : > { %s693_s8 = smov 64   ;;  %s694_s9 = smov 4  }
  0x28   : > { %506 = dma.hbm_to_vmem [thread:$0]  (!%p770_p11), %s930_s1, 512, %s763_s22, [#allocation6], %s693_s8, %s693_s8, %s694_s9  }
  0x29   : > { %p25_p1 = scmp.eq.s32.totalorder %s24_s26, 0  ;;  %p34_p2 = scmp.ne.s32.totalorder %s686_s14, %s682_s13 }
  0x2a   : > { %p35_p4 = scmp.eq.s32.totalorder %s690_s15, 0  ;;  %p516_p6 = scmp.lt.s32.totalorder %s690_s15, 2 }
  0x2b   : > { %s809_s17 = scalar_select %p25_p1, %s686_s14, %s27_s25  }
  0x2c   : > { %p36_p8 = por %p35_p4, %p34_p2  ;;  %p940_p10 = scmp.eq.s32.totalorder %s740_s16, 1 }
  0x2d   : > { %s148_s23 = sand.u32 1, %s686_s14   ;;  %s460_s27 = sshll.u32 %s690_s15, 8 }
  0x2e   : > { %p813_p12 = por %p940_p10, %p34_p2  ;;  %s435_s28 = sshll.u32 %s148_s23, 4 }
  0x2f   : > { %s822_s4 = scalar_lea.hbm %s929_s0, %s460_s27  ;;  %s152_s22 = scalar_lea.vmem [#allocation2], %s435_s28 }
  0x30   : > { %s159_s25 = sshll.u32 %s152_s22, 4  ;;  %p824_p11 = pnand %p516_p6, %p36_p8  ;;  %s828_s25 = int_to_ptr.vmem [resolvable:$true] %s159_s25 }
  0x31   : > { %s830_s5 = scalar_lea.sflag [#allocation3], %s148_s23  ;;  %s590_s6 = scalar_lea.hbm %s822_s4, 256 }
  0x32   : > { %p591_p13 = scmp.ne.s32.totalorder %s822_s4, %s590_s6  ;;  %p592_p0 = pneg %p824_p11 }
  0x33   : > { %s595_s11 = scalar_lea.hbm %s929_s0, 512  ;;  %p596_p7 = scmp.lt.u32.totalorder %s822_s4, %s929_s0 }
  0x34   : > { %p593_p3 = pnand %p592_p0, %p591_p13  ;;  %p597_p9 = scmp.lt.u32.totalorder %s595_s11, %s590_s6 }
  0x35   : > { %p599_p2 = scmp.lt.u32.totalorder %s590_s6, %s822_s4 }
  0x36   : > { %p594_p5 = pneg %p593_p3  ;;  %p598_p1 = por %p597_p9, %p596_p7 }
  0x38   : > { %p600_p4 = por %p599_p2, %p598_p1 }
  0x3a   : > { %p601_p6 = pnand %p600_p4, %p594_p5 }
  0x3c   : > { %604 = shalt.err (!%p601_p6)
}
  0x3d   : > { %s605_s23 = scalar_lea.vmem %s828_s25, 256  ;;  %s695_s29 = smov [#allocation2]  }
  0x3e   : > { %p606_p8 = scmp.ne.s32.totalorder %s828_s25, %s605_s23  ;;  %s610_s30 = sshll.u32 %s695_s29, 4  ;;  %s611_s30 = int_to_ptr.vmem [resolvable:$false] %s610_s30 }
  0x3f   : > { %s612_s22 = scalar_lea.vmem %s611_s30, 512  ;;  %p613_p3 = scmp.lt.s32.totalorder %s828_s25, %s611_s30 }
  0x40   : > { %p608_p10 = pnand %p606_p8, %p592_p0  ;;  %p614_p7 = scmp.lt.s32.totalorder %s612_s22, %s605_s23 }
  0x42   : > { %p609_p13 = pneg %p608_p10  ;;  %p615_p9 = por %p614_p7, %p613_p3 }
  0x44   : > { %p616_p1 = pnand %p615_p9, %p609_p13 }
  0x46   : > { %619 = shalt.err (!%p616_p1)
}
  0x47   : > { %510 = dma.hbm_to_vmem [thread:$0]  (!%p824_p11), %s822_s4, 256, %s828_s25, %s830_s5, %s693_s8, %s693_s8, %s694_s9  }
  0x48   : > { %p943_p0 = scmp.ne.s32.totalorder %s938_s20, 0 }
  0x49   : > { %s864_s6 = sand.u32 (!%p943_p0), 1, %s682_s13   ;;  %p944_p5 = scmp.ne.s32.totalorder (!%p943_p0), %s936_s18, 0 }
  0x4a   : > { %171 = sbr.rel (%p943_p0) target bundleno = 336 (0x150), region = 32  ;;  %s439_s7 = sshll.u32 (!%p943_p0), %s864_s6, 4 }
  0x4b   : > { %s174_s10 = scalar_lea.sflag (!%p943_p0), [#allocation3], %s864_s6  ;;  %s177_s11 = scalar_lea.vmem (!%p943_p0), [#allocation2], %s439_s7 }
  0x51   : > { %665 = dma.done.wait (%p944_p5), %s174_s10, 256  }
  0x52   : > { %667 = vsyncadd (%p944_p5), %s174_s10, 4294967040  ;;  %p945_p2 = scmp.eq.s32.totalorder %s740_s16, 0 }
  0x54   : > { %669 = dma.done.wait (%p945_p2), [#allocation6], 512   ;;  %p946_p11 = pmov %p945_p2 }
  0x55   : > { %v556_v0 = vld [vmem:[#allocation5] sm:$0xff]   ;;  %v557_v1 = vld [vmem:[#allocation5 + $0x8] sm:$0xff]   ;;  %v558_v2 = vld [vmem:[#allocation5 + $0x10] sm:$0xff]   ;;  %vm258_vm0 = vcmask 523264   ;;  %s203_s8 = scalar_lea.vmem [#allocation7], %s439_s7  ;;  %s465_s4 = sshll.u32 %s740_s16, 8 }
  0x56   : > { %671 = vsyncadd (%p946_p11), [#allocation6], 4294966784  ;;  %483 = vmatprep.subr.bf16.mxu0 %v556_v0  ;;  %v560_v3 = vld [vmem:[%s177_s11] sm:$0xff]   ;;  %v559_v4 = vld [vmem:[#allocation5 + $0x18] sm:$0xff]   ;;  %s348_s9 = sshll.u32 %s203_s8, 4  ;;  %s885_s5 = scalar_lea.hbm %s932_s3, %s465_s4  ;;  %s880_s9 = int_to_ptr.vmem [resolvable:$true] %s348_s9 }
  0x57   : > { %484 = vmatpush3.bf16.msra.mxu0 %v556_v0  ;;  %491 = vmatprep.mubr.msk.bf16.mxu0 %vm258_vm0, %v560_v3  ;;  %v561_v5 = vld [vmem:[%s177_s11 + $0x8] sm:$0xff]   ;;  %v442_v7 = vld [vmem:[%s931_s2] ss:$0 sm:$0xff]  ;;  %s335_s16 = scalar_lea.sflag [#allocation4], %s864_s6  ;;  %s620_s27 = scalar_lea.vmem %s880_s9, 256 }
  0x58   : > { %485 = vmatprep.subr.bf16.mxu0 %v557_v1  ;;  %p621_p4 = scmp.ne.s32.totalorder %s880_s9, %s620_s27  ;;  %s696_s28 = smov [#allocation7]  }
  0x59   : > { %s624_s23 = sshll.u32 %s696_s28, 4  ;;  %s625_s23 = int_to_ptr.vmem [resolvable:$false] %s624_s23 }
  0x5a   : > { %p622_p6 = pnand %p621_p4, %p813_p12  ;;  %s626_s29 = scalar_lea.vmem %s625_s23, 512 }
  0x5b   : > { %486 = vmatpush3.bf16.msra.mxu0 %v557_v1  ;;  %p627_p10 = scmp.lt.s32.totalorder %s880_s9, %s625_s23  ;;  %p628_p13 = scmp.lt.s32.totalorder %s626_s29, %s620_s27 }
  0x5c   : > { %487 = vmatprep.subr.bf16.mxu0 %v558_v2  ;;  %p623_p8 = pneg %p622_p6 }
  0x5d   : > { %p629_p3 = por %p628_p13, %p627_p10 }
  0x5f   : > { %488 = vmatpush3.bf16.msra.mxu0 %v558_v2  ;;  %p630_p7 = pnand %p629_p3, %p623_p8 }
  0x60   : > { %489 = vmatprep.subr.bf16.mxu0 %v559_v4 }
  0x63   : > { %490 = vmatpush3.bf16.msra.mxu0 %v559_v4 }
  0x66   : > { %492 = vmatmul.mubr.msk.bf16.vlgmr.msra.gmra.mrb[0].mxu0 %vm258_vm0, %v561_v5 }
 0x139   : > { %v493_v6 = vpop.f32.mrb[0].mxu0 }
 0x13a   : > { %v299_v8 = vpop.f32.mrb[1].mxu0  ;;  %v308_v10 = vadd.f32 %v493_v6, %v442_v7 }
 0x13b   : > { %v494_v9 = vpop.f32.mrb[2].mxu0  ;;  %v300_v13 = vadd.f32 %v442_v7, %v299_v8 }
 0x13c   : > { %v311_v11 = vadd.f32 %v494_v9, %v442_v7  ;;  %v302_v12 = vpop.f32.mrb[3].mxu0 }
 0x13d   : > { %v303_v14 = vadd.f32 %v442_v7, %v302_v12 }
 0x13e   : > { %v474_v15 = vpack.c.bf16 %v311_v11, %v308_v10 }
 0x13f   : > { %v469_v16 = vpack.c.bf16 %v303_v14, %v300_v13 }
 0x140   : > { %476 = vst [vmem:[%s203_s8 + $0x8] sm:$0xff] %v474_v15  }
 0x141   : > { %470 = vst [vmem:[%s203_s8] sm:$0xff] %v469_v16  }
 0x142   : > { %633 = shalt.err (!%p630_p7)
}
 0x143   : > { %s634_s30 = scalar_lea.hbm %s885_s5, 256  ;;  %s638_s10 = scalar_lea.hbm %s932_s3, 512 }
 0x144   : > { %p635_p9 = scmp.ne.s32.totalorder %s885_s5, %s634_s30  ;;  %p639_p5 = scmp.lt.u32.totalorder %s885_s5, %s932_s3 }
 0x145   : > { %p640_p2 = scmp.lt.u32.totalorder %s638_s10, %s634_s30  ;;  %p642_p4 = scmp.lt.u32.totalorder %s634_s30, %s885_s5 }
 0x146   : > { %p636_p1 = pnand %p635_p9, %p813_p12 }
 0x147   : > { %p641_p11 = por %p640_p2, %p639_p5 }
 0x148   : > { %p637_p0 = pneg %p636_p1 }
 0x149   : > { %p643_p6 = por %p642_p4, %p641_p11 }
 0x14b   : > { %p644_p8 = pnand %p643_p6, %p637_p0 }
 0x14d   : > { %647 = shalt.err (!%p644_p8)
}
 0x14e   : > { %s697_s20 = smov 64   ;;  %s698_s8 = smov 4  }
 0x14f   : > { %501 = dma.vmem_to_hbm [thread:$0]  (%p813_p12), %s880_s9, 256, %s885_s5, %s335_s16, %s697_s20, %s697_s20, %s698_s8  }
 0x150 PF: > { %s363_s4 = sand.u32 1, %s678_s12   ;;  %p947_p10 = scmp.ne.s32.totalorder %s937_s19, 0 }
 0x151   : > { %p948_p13 = scmp.ge.s32.totalorder %s690_s15, 2  ;;  %s364_s25 = scalar_lea.sflag [#allocation4], %s363_s4 }
 0x153   : > { %p512_p3 = pnand %p948_p13, %p947_p10 }
 0x155   : > { %673 = dma.done.wait (!%p512_p3), %s364_s25, 256  }
 0x156   : > { %675 = vsyncadd (!%p512_p3), %s364_s25, 4294967040  ;;  %p17_p7 = scmp.ge.s32.totalorder %s775_s24, 4   ;;  %s949_s12 = smov %s682_s13 }
 0x157   : > { %s950_s13 = smov %s686_s14  ;;  %s951_s14 = smov %s809_s17 }
 0x158   : > { %s952_s15 = smov %s775_s24  ;;  %19 = sbr.rel (!%p17_p7) target bundleno = 6 (0x6), region = 81 }
 0x15f   :  { %369 = vsyncpa [#allocation3], 1 }
 0x160   :  { %371 = vsyncpa [#allocation3 + $0x1], 1 }
 0x161   :  { %372 = vsyncpa [#allocation6], 1 }
 0x162   :  { %373 = vsyncpa [#allocation4], 1 }
 0x163   :  { %375 = vsyncpa [#allocation4 + $0x1], 1 }

</bundles_post_ra>
